<compile_context>
chip_gen: v5e
topology: v5e:2x2
jax: 0.10.0
libtpu: 0.0.40
codegen_flags: <defaults>
</compile_context>

<pallas_src>
import functools

import jax
import jax.numpy as jnp
from jax.experimental import pallas as pl
from jax.experimental.pallas import tpu as pltpu

N_EMBD = 144
HIDDEN = 4 * N_EMBD   # 576
LANE = 128
SUBLANE = 8


def _round_up(n, m):
    return (n + m - 1) // m * m


def _ffn_kernel(x_ref, w1_ref, b1_ref, w2_ref, b2_ref, o_ref):
    # x_ref:  (tm, D)  f32   -> cast to bf16 here (hides under MXU)
    # w1_ref: (D, Hp)  bf16    b1_ref: (1, Hp) f32
    # w2_ref: (Hp, D)  bf16    b2_ref: (1, D)  f32
    # o_ref:  (tm, D)  f32
    x = x_ref[...].astype(jnp.bfloat16)
    # Fused chain: MXU result (f32) -> +bias -> ReLU -> bf16, so the hidden
    # slab is materialized once in f32 and once in bf16, nothing more.
    h = jnp.maximum(
        jnp.dot(x, w1_ref[...], preferred_element_type=jnp.float32)
        + b1_ref[...],
        0.0,
    ).astype(jnp.bfloat16)
    y = jnp.dot(h, w2_ref[...], preferred_element_type=jnp.float32)
    o_ref[...] = (y + b2_ref[...]).astype(o_ref.dtype)


def prepare_ffn_params(w1, b1, w2, b2):
    """One-time weight prep, hoisted out of the per-call path.

    Pads the hidden dim H -> Hp (multiple of 128) so the hidden slab and the
    second matmul's K stream are lane-dense (exact: padded w1 columns and w2
    rows are zero, so padded hidden units contribute nothing), and casts
    weights to bf16 (native MXU dtype).  Biases stay f32.
    """
    D, H = w1.shape
    Hp = _round_up(H, LANE)
    w1p = jnp.pad(w1, ((0, 0), (0, Hp - H))).astype(jnp.bfloat16)
    b1p = jnp.pad(b1, (0, Hp - H)).reshape(1, Hp).astype(jnp.float32)
    w2p = jnp.pad(w2, ((0, Hp - H), (0, 0))).astype(jnp.bfloat16)
    b2p = b2.reshape(1, D).astype(jnp.float32)
    return w1p, b1p, w2p, b2p


@functools.partial(jax.jit, static_argnames=("tm",))
def feed_forward(x, w1p, b1p, w2p, b2p, *, tm=1024):
    """x: [B, T, n_embd] f32; params from prepare_ffn_params. Returns f32."""
    B, T, D = x.shape
    M = B * T
    Hp = w1p.shape[1]
    assert D == w1p.shape[0]

    # Row tiling: >= 2 grid steps (v7x megacore), tile derived from M so row
    # padding is at most a few sublanes (usually zero).
    n_steps = max(2, pl.cdiv(M, tm))
    tm_eff = min(tm, _round_up(pl.cdiv(M, n_steps), SUBLANE))
    grid_m = pl.cdiv(M, tm_eff)
    Mp = grid_m * tm_eff

    x2d = x.reshape(M, D)                       # metadata-only reshape
    if Mp != M:                                 # at most ~8*grid_m pad rows
        x2d = jnp.pad(x2d, ((0, Mp - M), (0, 0)))

    flops = 2 * Mp * D * Hp + 2 * Mp * Hp * D
    bytes_accessed = (Mp * D * 4 +              # x  (f32 in; cast in-kernel)
                      Mp * D * 4 +              # out (f32)
                      D * Hp * 2 + Hp * D * 2 + # weights (bf16)
                      (Hp + D) * 4)             # biases (f32)

    out2d = pl.pallas_call(
        _ffn_kernel,
        out_shape=jax.ShapeDtypeStruct((Mp, D), x.dtype),
        grid_spec=pltpu.PrefetchScalarGridSpec(
            num_scalar_prefetch=0,
            grid=(grid_m,),
            in_specs=[
                pl.BlockSpec((tm_eff, D), lambda i: (i, 0)),   # x row tile
                # Grid-invariant blocks below are DMA'd once (constant index
                # map); Buffered(1) skipped -- VMEM is nowhere near the limit.
                pl.BlockSpec((D, Hp), lambda i: (0, 0)),       # w1 (full)
                pl.BlockSpec((1, Hp), lambda i: (0, 0)),       # b1
                pl.BlockSpec((Hp, D), lambda i: (0, 0)),       # w2 (full)
                pl.BlockSpec((1, D), lambda i: (0, 0)),        # b2
            ],
            out_specs=pl.BlockSpec((tm_eff, D), lambda i: (i, 0)),
        ),
        compiler_params=pltpu.CompilerParams(
            dimension_semantics=("parallel",),
        ),
        cost_estimate=pl.CostEstimate(
            flops=flops, transcendentals=0, bytes_accessed=bytes_accessed),
    )(x2d, w1p, b1p, w2p, b2p)

    if Mp != M:
        out2d = out2d[:M]
    return out2d.reshape(B, T, D)


def _reference(x, w1, b1, w2, b2):
    h = jnp.maximum(x @ w1 + b1, 0.0)
    return h @ w2 + b2


if __name__ == "__main__":
    key = jax.random.PRNGKey(0)
    k_x1, k_x2, k_x3, k_w1, k_b1, k_w2, k_b2 = jax.random.split(key, 7)

    # Deterministic synthetic parameters (built directly as (in, out) since
    # the matmul uses x @ W, matching PyTorch's x @ W.T convention).
    scale1 = 1.0 / jnp.sqrt(N_EMBD)
    scale2 = 1.0 / jnp.sqrt(HIDDEN)
    w1 = jax.random.uniform(k_w1, (N_EMBD, HIDDEN), jnp.float32, -scale1, scale1)
    b1 = jax.random.uniform(k_b1, (HIDDEN,), jnp.float32, -scale1, scale1)
    w2 = jax.random.uniform(k_w2, (HIDDEN, N_EMBD), jnp.float32, -scale2, scale2)
    b2 = jax.random.uniform(k_b2, (N_EMBD,), jnp.float32, -scale2, scale2)

    params = prepare_ffn_params(w1, b1, w2, b2)   # one-time, outside hot path

    def check(x, tag):
        out = jax.block_until_ready(feed_forward(x, *params))
        ref = _reference(x, w1, b1, w2, b2)
        assert out.shape == x.shape, tag
        # bf16 operands / f32 accumulation -> loosened tolerance vs f32 ref.
        assert jnp.allclose(out, ref, atol=2e-2, rtol=2e-2), f"mismatch ({tag})"

    # M=16: tile shrinks to 8 rows, grid=2 (both v7x cores), zero padding.
    check(jax.random.normal(k_x1, (2, 8, N_EMBD), dtype=jnp.float32), "small")
    # M=640: tm_eff=320, grid=2, zero padding.
    check(jax.random.normal(k_x2, (4, 160, N_EMBD), dtype=jnp.float32), "medium")
    # M=150: tm_eff=80, grid=2, 10 rows of padding (exercises the pad path).
    check(jax.random.normal(k_x3, (3, 50, N_EMBD), dtype=jnp.float32), "ragged")

    print("KERNEL_OK")
</pallas_src>

<mosaic_0001>
module attributes {stable_mosaic.version = 11 : i64} {
  func.func @_ffn_kernel(%arg0: i32, %arg1: memref<8x144xf32, #tpu.memory_space<vmem>>, %arg2: memref<144x640xbf16, #tpu.memory_space<vmem>>, %arg3: memref<1x640xf32, #tpu.memory_space<vmem>>, %arg4: memref<640x144xbf16, #tpu.memory_space<vmem>>, %arg5: memref<1x144xf32, #tpu.memory_space<vmem>>, %arg6: memref<8x144xf32, #tpu.memory_space<vmem>>) attributes {dimension_semantics = [#tpu.dimension_semantics<parallel>], iteration_bounds = array<i64: 2>, scalar_prefetch = 0 : i64, scratch_operands = 0 : i64, tpu.core_type = #tpu.core_type<tc>, window_params = [{transform_indices = @transform_0, window_bounds = array<i64: 8, 144>}, {pipeline_mode = #tpu.pipeline_mode<synchronous>, transform_indices = @transform_1, window_bounds = array<i64: 144, 640>}, {pipeline_mode = #tpu.pipeline_mode<synchronous>, transform_indices = @transform_2, window_bounds = array<i64: 1, 640>}, {pipeline_mode = #tpu.pipeline_mode<synchronous>, transform_indices = @transform_3, window_bounds = array<i64: 640, 144>}, {pipeline_mode = #tpu.pipeline_mode<synchronous>, transform_indices = @transform_4, window_bounds = array<i64: 1, 144>}, {transform_indices = @transform_5, window_bounds = array<i64: 8, 144>}]} {
    %c0 = arith.constant 0 : index
    %c0_0 = arith.constant 0 : index
    %0 = vector.load %arg1[%c0, %c0_0] : memref<8x144xf32, #tpu.memory_space<vmem>>, vector<8x144xf32>
    %1 = arith.truncf %0 : vector<8x144xf32> to vector<8x144xbf16>
    %c0_1 = arith.constant 0 : index
    %c0_2 = arith.constant 0 : index
    %2 = vector.load %arg2[%c0_1, %c0_2] : memref<144x640xbf16, #tpu.memory_space<vmem>>, vector<144x640xbf16>
    %cst = arith.constant dense<0.000000e+00> : vector<8x640xf32>
    %3 = tpu.matmul %1, %2, %cst {dimension_numbers = #tpu.dot_dimension_numbers<[1], [0], [0], [1], [0, 0, 1, 1], [], []>} : vector<8x144xbf16>, vector<144x640xbf16>, vector<8x640xf32> -> vector<8x640xf32>
    %c0_3 = arith.constant 0 : index
    %c0_4 = arith.constant 0 : index
    %4 = vector.load %arg3[%c0_3, %c0_4] : memref<1x640xf32, #tpu.memory_space<vmem>>, vector<1x640xf32>
    %5 = vector.broadcast %4 : vector<1x640xf32> to vector<8x640xf32>
    %6 = arith.addf %3, %5 : vector<8x640xf32>
    %cst_5 = arith.constant 0.000000e+00 : f32
    %7 = vector.broadcast %cst_5 : f32 to vector<8x640xf32>
    %8 = arith.maximumf %6, %7 : vector<8x640xf32>
    %9 = arith.truncf %8 : vector<8x640xf32> to vector<8x640xbf16>
    %c0_6 = arith.constant 0 : index
    %c0_7 = arith.constant 0 : index
    %10 = vector.load %arg4[%c0_6, %c0_7] : memref<640x144xbf16, #tpu.memory_space<vmem>>, vector<640x144xbf16>
    %cst_8 = arith.constant dense<0.000000e+00> : vector<8x144xf32>
    %11 = tpu.matmul %9, %10, %cst_8 {dimension_numbers = #tpu.dot_dimension_numbers<[1], [0], [0], [1], [0, 0, 1, 1], [], []>} : vector<8x640xbf16>, vector<640x144xbf16>, vector<8x144xf32> -> vector<8x144xf32>
    %c0_9 = arith.constant 0 : index
    %c0_10 = arith.constant 0 : index
    %12 = vector.load %arg5[%c0_9, %c0_10] : memref<1x144xf32, #tpu.memory_space<vmem>>, vector<1x144xf32>
    %13 = vector.broadcast %12 : vector<1x144xf32> to vector<8x144xf32>
    %14 = arith.addf %11, %13 : vector<8x144xf32>
    %c0_11 = arith.constant 0 : index
    %c0_12 = arith.constant 0 : index
    %15 = vector.load %arg6[%c0_11, %c0_12] : memref<8x144xf32, #tpu.memory_space<vmem>>, vector<8x144xf32>
    tpu.vector_store %arg6[%c0_11, %c0_12], %14 {strides = array<i32>} : memref<8x144xf32, #tpu.memory_space<vmem>>, vector<8x144xf32>,
    return
  }
  func.func @transform_0(%arg0: i32) -> (i32, i32) {
    %c0_i32 = arith.constant 0 : i32
    %c0_i32_0 = arith.constant 0 : i32
    return %arg0, %c0_i32 : i32, i32
  }
  func.func @transform_1(%arg0: i32) -> (i32, i32) {
    %c0_i32 = arith.constant 0 : i32
    %c0_i32_0 = arith.constant 0 : i32
    %c0_i32_1 = arith.constant 0 : i32
    return %c0_i32, %c0_i32_0 : i32, i32
  }
  func.func @transform_2(%arg0: i32) -> (i32, i32) {
    %c0_i32 = arith.constant 0 : i32
    %c0_i32_0 = arith.constant 0 : i32
    %c0_i32_1 = arith.constant 0 : i32
    return %c0_i32, %c0_i32_0 : i32, i32
  }
  func.func @transform_3(%arg0: i32) -> (i32, i32) {
    %c0_i32 = arith.constant 0 : i32
    %c0_i32_0 = arith.constant 0 : i32
    %c0_i32_1 = arith.constant 0 : i32
    return %c0_i32, %c0_i32_0 : i32, i32
  }
  func.func @transform_4(%arg0: i32) -> (i32, i32) {
    %c0_i32 = arith.constant 0 : i32
    %c0_i32_0 = arith.constant 0 : i32
    %c0_i32_1 = arith.constant 0 : i32
    return %c0_i32, %c0_i32_0 : i32, i32
  }
  func.func @transform_5(%arg0: i32) -> (i32, i32) {
    %c0_i32 = arith.constant 0 : i32
    %c0_i32_0 = arith.constant 0 : i32
    return %arg0, %c0_i32 : i32, i32
  }
}

</mosaic_0001>

<bundles_post_ra>
// kernel: feed_forward.1
= control target key start
LH: loop header
LB: loop body
LE: loop exit
PB: predicated region body
PF: predicated region fallthrough
CT: control target
= control target key end

     0   :  { %10 = vsyncpa [#allocation3], 0  ;;  %s3033_s0 = inlined_call_operand.vmem [shape: f32[16,144], index: 0, kind: input, shape index: {}]   ;;  %s3034_s1 = inlined_call_operand.vmem [shape: bf16[144,640], index: 1, kind: input, shape index: {}]   ;;  %s3035_s2 = inlined_call_operand.vmem [shape: f32[1,640], index: 2, kind: input, shape index: {}]   ;;  %s3036_s3 = inlined_call_operand.vmem [shape: bf16[640,144], index: 3, kind: input, shape index: {}]   ;;  %s3037_s4 = inlined_call_operand.vmem [shape: f32[1,144], index: 4, kind: input, shape index: {}]   ;;  %s3038_s5 = inlined_call_operand.hbm [shape: f32[16,144], index: 5, kind: output, shape index: {}]  }
   0x1   :  { %12 = vsyncpa [#allocation3 + $0x1], 0  ;;  %s2143_s18 = smov 0   ;;  %s2145_s19 = smov 0  }
   0x2   :  { %s2147_s20 = smov 0   ;;  %s2149_s21 = smov 0  }
   0x3 LB: > { %s2164_s22 = sadd.s32 4294967295, %s2111_s21   ;;  %s1366_s23 = sadd.s32 4294967294, %s2111_s21   ;;  %s2111_s21 = sphi %s2149_s21, %s3044_s21   ;;  %s2107_s20 = sphi %s2147_s20, %s3043_s20   ;;  %s2103_s19 = sphi %s2145_s19, %s3042_s19   ;;  %s2099_s18 = sphi %s2143_s18, %s3041_s18  }
   0x4   : > { %s2168_s24 = sadd.s32 1, %s2111_s21   ;;  %s135_s25 = sadd.s32 1, %s2107_s20 }
   0x5   : > { %s132_s26 = ssub.s32 %s2111_s21, %s2168_s24  ;;  %p145_p0 = scmp.ne.s32.totalorder %s2107_s20, %s2103_s19 }
   0x6   : > { %p133_p1 = scmp.eq.s32.totalorder %s132_s26, 0  ;;  %p146_p2 = scmp.eq.s32.totalorder %s2164_s22, 1 }
   0x7   : > { %p151_p3 = scmp.ne.s32.totalorder %s2103_s19, %s2099_s18  ;;  %p152_p4 = scmp.eq.s32.totalorder %s1366_s23, 1 }
   0x8   : > { %s2179_s27 = scalar_select %p133_p1, %s2107_s20, %s135_s25  }
   0x9   : > { %p2181_p5 = por %p146_p2, %p145_p0  ;;  %p2185_p6 = por %p152_p4, %p151_p3 }
   0xa   : > { %p1369_p7 = scmp.ge.s32.totalorder %s2111_s21, 1  ;;  %p190_p8 = scmp.lt.s32.totalorder %s2111_s21, 3 }
   0xc   : > { %p191_p9 = pnand %p1369_p7, %p190_p8 }
   0xd   : > { %p218_p10 = scmp.lt.s32.totalorder (!%p191_p9), %s2164_s22, 1  ;;  %s215_s7 = sand.u32 (!%p191_p9), 1, %s2103_s19  }
   0xe   : > { %194 = sbr.rel (%p191_p9) target bundleno = 376 (0x178), region = 40  ;;  %s2009_s10 = sshll.u32 (!%p191_p9), %s2164_s22, 4 }
   0xf   : > { %s1302_s12 = scalar_lea.hbm (!%p191_p9), %s3038_s5, %s2009_s10  ;;  %s2069_s26 = scalar_lea.hbm (!%p191_p9), %s3038_s5, 32 }
  0x10   : > { %s1306_s16 = sshll.u32 (!%p191_p9), %s1302_s12, 4  ;;  %s1307_s16 = int_to_ptr.hbm [resolvable:$true] %s1306_s16 }
  0x11   : > { %s2063_s17 = sshra.s32 (!%p191_p9), %s1307_s16, 4  ;;  %s2064_s17 = int_to_ptr.hbm [resolvable:$true] %s2063_s17 }
  0x12   : > { %s2065_s23 = scalar_lea.hbm (!%p191_p9), %s2064_s17, 16  ;;  %p2070_p0 = scmp.lt.s32.totalorder (!%p191_p9), %s2064_s17, %s3038_s5 }
  0x13   : > { %v1515_v0 = vld [vmem:[%s3034_s1 + $0x118] sm:$0xf]  ;;  %v1921_v1 = vld [vmem:[%s3034_s1 + $0x128] sm:$0xf0]  ;;  %v1535_v2 = vld [vmem:[%s3034_s1 + $0x140] sm:$0xf]  ;;  %p2066_p11 = scmp.ne.s32.totalorder %s2064_s17, %s2065_s23  ;;  %p2071_p1 = scmp.lt.s32.totalorder %s2069_s26, %s2065_s23 }
  0x14   : > { %v1516_v3 = vor.u32 %v1921_v1, %v1515_v0  ;;  %v1926_v4 = vld [vmem:[%s3034_s1 + $0x150] sm:$0xf0]  ;;  %v1919_v5 = vld [vmem:[%s3034_s1 + $0x11c] sm:$0xf]  ;;  %v1517_v6 = vld [vmem:[%s3034_s1 + $0x12c] sm:$0xf0] }
  0x15   : > { %v1536_v7 = vor.u32 %v1926_v4, %v1535_v2  ;;  %v1520_v8 = vor.u32 %v1919_v5, %v1517_v6  ;;  %v1523_v9 = vld [vmem:[%s3034_s1 + $0x120] sm:$0xf]  ;;  %v1922_v10 = vld [vmem:[%s3034_s1 + $0x130] sm:$0xf0]  ;;  %v1924_v11 = vld [vmem:[%s3034_s1 + $0x144] sm:$0xf]  ;;  %p2067_p12 = pnand %p2066_p11, %p2181_p5  ;;  %p2072_p2 = por %p2071_p1, %p2070_p0 }
  0x16   : > { %532 = vmatpush.bf16.msra.mxu0 %v1516_v3  ;;  %v1524_v12 = vor.u32 %v1922_v10, %v1523_v9  ;;  %v1537_v13 = vld [vmem:[%s3034_s1 + $0x154] sm:$0xf0]  ;;  %v1495_v14 = vld [vmem:[%s3034_s1 + $0xf0] sm:$0xf]  ;;  %v1916_v15 = vld [vmem:[%s3034_s1 + $0x100] sm:$0xf0] }
  0x17   : > { %552 = vmatpush.bf16.msra.mxu1 %v1536_v7  ;;  %558 = vmatpush.bf16.msra.mxu2 %v1520_v8  ;;  %v1540_v16 = vor.u32 %v1924_v11, %v1537_v13  ;;  %v1496_v17 = vor.u32 %v1916_v15, %v1495_v14  ;;  %v1914_v18 = vld [vmem:[%s3034_s1 + $0xf4] sm:$0xf]  ;;  %v1497_v19 = vld [vmem:[%s3034_s1 + $0x104] sm:$0xf0]  ;;  %v1503_v20 = vld [vmem:[%s3034_s1 + $0xf8] sm:$0xf]  ;;  %p2068_p13 = pneg %p2067_p12 }
  0x18   : > { %v1500_v21 = vor.u32 %v1914_v18, %v1497_v19  ;;  %v1917_v22 = vld [vmem:[%s3034_s1 + $0x108] sm:$0xf0]  ;;  %v1543_v23 = vld [vmem:[%s3034_s1 + $0x148] sm:$0xf]  ;;  %v1927_v25 = vld [vmem:[%s3034_s1 + $0x158] sm:$0xf0] }
  0x19   : > { %578 = vmatpush.bf16.msra.mxu3 %v1540_v16  ;;  %v1504_v24 = vor.u32 %v1917_v22, %v1503_v20  ;;  %v1920_v26 = vld [vmem:[%s3034_s1 + $0x124] sm:$0xf]  ;;  %v1525_v27 = vld [vmem:[%s3034_s1 + $0x134] sm:$0xf0]  ;;  %s219_s13 = scalar_select %p218_p10, %s2164_s22, 1  ;;  %v1544_v28 = vor.u32 %v1927_v25, %v1543_v23  ;;  %vm528_vm0 = vcmask 130048  }
  0x1a   : > { %533 = vmatpush.bf16.msra.mxu0 %v1496_v17  ;;  %v1475_v29 = vld [vmem:[%s3034_s1 + $0xc8] sm:$0xf]  ;;  %v1911_v30 = vld [vmem:[%s3034_s1 + $0xd8] sm:$0xf0]  ;;  %v1909_v32 = vld [vmem:[%s3034_s1 + $0xcc] sm:$0xf]  ;;  %v1528_v42 = vor.u32 %v1920_v26, %v1525_v27  ;;  %p2073_p3 = pnand %p2072_p2, %p2068_p13 }
  0x1b   : > { %584 = vmatpush.bf16.msrb.mxu1 %v1524_v12  ;;  %559 = vmatpush.bf16.msra.mxu2 %v1500_v21  ;;  %v1476_v31 = vor.u32 %v1911_v30, %v1475_v29  ;;  %v1477_v33 = vld [vmem:[%s3034_s1 + $0xdc] sm:$0xf0]  ;;  %v1483_v34 = vld [vmem:[%s3034_s1 + $0xd0] sm:$0xf]  ;;  %s1883_s8 = sshll.u32 %s219_s13, 4  ;;  %s1291_s22 = scalar_lea.sflag [#allocation3], %s215_s7 }
  0x1c   : > { %v1480_v35 = vor.u32 %v1909_v32, %v1477_v33  ;;  %v1912_v36 = vld [vmem:[%s3034_s1 + $0xe0] sm:$0xf0]  ;;  %s2274_s14 = scalar_lea.vmem %s3033_s0, %s1883_s8  ;;  %v1915_v38 = vld [vmem:[%s3034_s1 + $0xfc] sm:$0xf]  ;;  %v1455_v39 = vld [vmem:[%s3034_s1 + $0xa0] sm:$0xf] }
  0x1d   : > { %604 = vmatpush.bf16.msrb.mxu3 %v1544_v28  ;;  %v1484_v37 = vor.u32 %v1912_v36, %v1483_v34  ;;  %v1906_v40 = vld [vmem:[%s3034_s1 + $0xb0] sm:$0xf0]  ;;  %v225_v41 = vld [vmem:[%s2274_s14 + $0x8] sm:$0xff]  ;;  %v1904_v44 = vld [vmem:[%s3034_s1 + $0xa4] sm:$0xf]  ;;  %s1370_s8 = sshll.u32 %s215_s7, 4 }
  0x1e   : > { %534 = vmatpush.bf16.msra.mxu0 %v1476_v31  ;;  %v1456_v43 = vor.u32 %v1906_v40, %v1455_v39  ;;  %v1457_v45 = vld [vmem:[%s3034_s1 + $0xb4] sm:$0xf0]  ;;  %v2292_v46 = vpack.c.bf16 %v225_v41, %v225_v41  ;;  %v1505_v47 = vld [vmem:[%s3034_s1 + $0x10c] sm:$0xf0]  ;;  %v1463_v49 = vld [vmem:[%s3034_s1 + $0xa8] sm:$0xf] }
  0x1f   : > { %585 = vmatpush.bf16.msrb.mxu1 %v1504_v24  ;;  %560 = vmatpush.bf16.msra.mxu2 %v1480_v35  ;;  %v1460_v48 = vor.u32 %v1904_v44, %v1457_v45  ;;  %v1907_v50 = vld [vmem:[%s3034_s1 + $0xb8] sm:$0xf0]  ;;  %v1435_v52 = vld [vmem:[%s3034_s1 + $0x78] sm:$0xf]  ;;  %v1901_v53 = vld [vmem:[%s3034_s1 + $0x88] sm:$0xf0]  ;;  %v1508_v57 = vor.u32 %v1915_v38, %v1505_v47 }
  0x20   : > { %v1464_v51 = vor.u32 %v1907_v50, %v1463_v49  ;;  %1554 = vmatmul.msk.bf16.vlgmr.msra.gmra.mxu3 %vm528_vm0, %v2292_v46  ;;  %1553 = vmatmul.msk.bf16.vlgmr.msra.gmra.mxu1 %vm528_vm0, %v2292_v46  ;;  %v1899_v54 = vld [vmem:[%s3034_s1 + $0x7c] sm:$0xf]  ;;  %v1437_v55 = vld [vmem:[%s3034_s1 + $0x8c] sm:$0xf0]  ;;  %v1443_v56 = vld [vmem:[%s3034_s1 + $0x80] sm:$0xf]  ;;  %v1436_v59 = vor.u32 %v1901_v53, %v1435_v52 }
  0x21   : > { %610 = vmatpush.bf16.msra.mxu3 %v1528_v42  ;;  %v1910_v58 = vld [vmem:[%s3034_s1 + $0xd4] sm:$0xf]  ;;  %v1485_v61 = vld [vmem:[%s3034_s1 + $0xe4] sm:$0xf0]  ;;  %v1440_v62 = vor.u32 %v1899_v54, %v1437_v55  ;;  %v1415_v63 = vld [vmem:[%s3034_s1 + $0x50] sm:$0xf] }
  0x22   : > { %535 = vmatpush.bf16.msra.mxu0 %v1456_v43  ;;  %v1902_v60 = vld [vmem:[%s3034_s1 + $0x90] sm:$0xf0]  ;;  %v1896_v0 = vld [vmem:[%s3034_s1 + $0x60] sm:$0xf0]  ;;  %v1417_v3 = vld [vmem:[%s3034_s1 + $0x64] sm:$0xf0]  ;;  %v1488_v6 = vor.u32 %v1910_v58, %v1485_v61 }
  0x23   : > { %586 = vmatpush.bf16.msrb.mxu1 %v1484_v37  ;;  %561 = vmatpush.bf16.msra.mxu2 %v1460_v48  ;;  %v1444_v1 = vor.u32 %v1902_v60, %v1443_v56  ;;  %v1894_v2 = vld [vmem:[%s3034_s1 + $0x54] sm:$0xf]  ;;  %v1423_v4 = vld [vmem:[%s3034_s1 + $0x58] sm:$0xf]  ;;  %v1897_v5 = vld [vmem:[%s3034_s1 + $0x68] sm:$0xf0]  ;;  %v1416_v8 = vor.u32 %v1896_v0, %v1415_v63 }
  0x24   : > { %v1905_v7 = vld [vmem:[%s3034_s1 + $0xac] sm:$0xf]  ;;  %v1465_v9 = vld [vmem:[%s3034_s1 + $0xbc] sm:$0xf0]  ;;  %v1420_v10 = vor.u32 %v1894_v2, %v1417_v3  ;;  %v1395_v11 = vld [vmem:[%s3034_s1 + $0x28] sm:$0xf]  ;;  %v1424_v13 = vor.u32 %v1897_v5, %v1423_v4 }
  0x25   : > { %611 = vmatpush.bf16.msra.mxu3 %v1508_v57  ;;  %v1891_v12 = vld [vmem:[%s3034_s1 + $0x38] sm:$0xf0]  ;;  %v1889_v14 = vld [vmem:[%s3034_s1 + $0x2c] sm:$0xf]  ;;  %v1397_v15 = vld [vmem:[%s3034_s1 + $0x3c] sm:$0xf0]  ;;  %v1468_v18 = vor.u32 %v1905_v7, %v1465_v9 }
  0x26   : > { %536 = vmatpush.bf16.msra.mxu0 %v1436_v59  ;;  %v1403_v16 = vld [vmem:[%s3034_s1 + $0x30] sm:$0xf]  ;;  %v1892_v17 = vld [vmem:[%s3034_s1 + $0x40] sm:$0xf0]  ;;  %v1396_v20 = vor.u32 %v1891_v12, %v1395_v11  ;;  %v1445_v21 = vld [vmem:[%s3034_s1 + $0x94] sm:$0xf0]  ;;  %v1400_v22 = vor.u32 %v1889_v14, %v1397_v15 }
  0x27   : > { %587 = vmatpush.bf16.msrb.mxu1 %v1464_v51  ;;  %562 = vmatpush.bf16.msra.mxu2 %v1440_v62  ;;  %v1900_v19 = vld [vmem:[%s3034_s1 + $0x84] sm:$0xf]  ;;  %v1375_v23 = vld [vmem:[%s3034_s1] sm:$0xf]  ;;  %v1886_v24 = vld [vmem:[%s3034_s1 + $0x10] sm:$0xf0]  ;;  %v1404_v25 = vor.u32 %v1892_v17, %v1403_v16 }
  0x28   : > { %v1884_v26 = vld [vmem:[%s3034_s1 + $0x4] sm:$0xf]  ;;  %v1377_v27 = vld [vmem:[%s3034_s1 + $0x14] sm:$0xf0]  ;;  %v1383_v28 = vld [vmem:[%s3034_s1 + $0x8] sm:$0xf]  ;;  %v1448_v32 = vor.u32 %v1900_v19, %v1445_v21  ;;  %v1376_v33 = vor.u32 %v1886_v24, %v1375_v23 }
  0x29   : > { %612 = vmatpush.bf16.msra.mxu3 %v1488_v6  ;;  %v1887_v29 = vld [vmem:[%s3034_s1 + $0x18] sm:$0xf0]  ;;  %v1531_v30 = vld [vmem:[%s3034_s1 + $0x128] sm:$0xf]  ;;  %v224_v34 = vld [vmem:[%s2274_s14] sm:$0xff]  ;;  %v1380_v38 = vor.u32 %v1884_v26, %v1377_v27  ;;  %s217_s9 = scalar_lea.vmem [#allocation2], %s1370_s8 }
  0x2a   : > { %537 = vmatpush.bf16.msra.mxu0 %v1416_v8  ;;  %v1923_v31 = vld [vmem:[%s3034_s1 + $0x138] sm:$0xf0]  ;;  %v1925_v35 = vld [vmem:[%s3034_s1 + $0x14c] sm:$0xf]  ;;  %v1425_v37 = vld [vmem:[%s3034_s1 + $0x6c] sm:$0xf0]  ;;  %v1384_v40 = vor.u32 %v1887_v29, %v1383_v28  ;;  %v2418_v43 = vpack.c.bf16 %v224_v34, %v224_v34 }
  0x2b   : > { %588 = vmatpush.bf16.msrb.mxu1 %v1444_v1  ;;  %563 = vmatpush.bf16.msra.mxu2 %v1420_v10  ;;  %v1895_v36 = vld [vmem:[%s3034_s1 + $0x5c] sm:$0xf]  ;;  %v1545_v39 = vld [vmem:[%s3034_s1 + $0x15c] sm:$0xf0]  ;;  %v1532_v41 = vor.u32 %v1923_v31, %v1531_v30  ;;  %v1918_v45 = vld [vmem:[%s3034_s1 + $0x110] sm:$0xf0] }
  0x2c   : > { %v1548_v42 = vor.u32 %v1925_v35, %v1545_v39  ;;  %v1511_v44 = vld [vmem:[%s3034_s1 + $0x100] sm:$0xf]  ;;  %v1428_v47 = vor.u32 %v1895_v36, %v1425_v37  ;;  %v1890_v48 = vld [vmem:[%s3034_s1 + $0x34] sm:$0xf]  ;;  %v1405_v49 = vld [vmem:[%s3034_s1 + $0x44] sm:$0xf0] }
  0x2d   : > { %613 = vmatpush.bf16.msra.mxu3 %v1468_v18  ;;  %v1680_v50 = vld [vmem:[%s3036_s3 + $0xf0] sm:$0xf]  ;;  %v1960_v51 = vld [vmem:[%s3036_s3 + $0xf4] sm:$0xf0]  ;;  %v1512_v52 = vor.u32 %v1918_v45, %v1511_v44  ;;  %v1913_v55 = vld [vmem:[%s3034_s1 + $0xe8] sm:$0xf0]  ;;  %v1408_v58 = vor.u32 %v1890_v48, %v1405_v49 }
  0x2e   : > { %538 = vmatpush.bf16.msra.mxu0 %v1396_v20  ;;  %v1491_v53 = vld [vmem:[%s3034_s1 + $0xd8] sm:$0xf]  ;;  %v1681_v54 = vor.u32 %v1960_v51, %v1680_v50  ;;  %v1672_v56 = vld [vmem:[%s3036_s3 + $0xe0] sm:$0xf]  ;;  %v1958_v57 = vld [vmem:[%s3036_s3 + $0xe4] sm:$0xf0] }
  0x2f   : > { %589 = vmatpush.bf16.msrb.mxu1 %v1424_v13  ;;  %564 = vmatpush.bf16.msra.mxu2 %v1400_v22  ;;  %v1885_v59 = vld [vmem:[%s3034_s1 + $0xc] sm:$0xf]  ;;  %v1385_v60 = vld [vmem:[%s3034_s1 + $0x1c] sm:$0xf0]  ;;  %v1471_v61 = vld [vmem:[%s3034_s1 + $0xb0] sm:$0xf]  ;;  %v1492_v1 = vor.u32 %v1913_v55, %v1491_v53  ;;  %v1673_v4 = vor.u32 %v1958_v57, %v1672_v56 }
  0x30   : > { %1555 = vmatmul.msk.bf16.vlgmr.msrb.gmra.mxu3 %vm528_vm0, %v2292_v46  ;;  %v1908_v62 = vld [vmem:[%s3034_s1 + $0xc0] sm:$0xf0]  ;;  %v1616_v63 = vld [vmem:[%s3036_s3 + $0x70] sm:$0xf]  ;;  %v1944_v0 = vld [vmem:[%s3036_s3 + $0x74] sm:$0xf0]  ;;  %v1388_v10 = vor.u32 %v1885_v59, %v1385_v60 }
  0x31   : > { %614 = vmatpush.bf16.msra.mxu3 %v1448_v32  ;;  %v1551_v2 = vld [vmem:[%s3034_s1 + $0x150] sm:$0xf]  ;;  %v1928_v3 = vld [vmem:[%s3034_s1 + $0x160] sm:$0xf0]  ;;  %v1617_v6 = vor.u32 %v1944_v0, %v1616_v63  ;;  %v1956_v7 = vld [vmem:[%s3036_s3 + $0xd4] sm:$0xf0]  ;;  %v1472_v17 = vor.u32 %v1908_v62, %v1471_v61 }
  0x32   : > { %539 = vmatpush.bf16.msra.mxu0 %v1376_v33  ;;  %v1664_v5 = vld [vmem:[%s3036_s3 + $0xd0] sm:$0xf]  ;;  %v1608_v8 = vld [vmem:[%s3036_s3 + $0x60] sm:$0xf]  ;;  %v1942_v9 = vld [vmem:[%s3036_s3 + $0x64] sm:$0xf0]  ;;  %v1552_v13 = vor.u32 %v1928_v3, %v1551_v2 }
  0x33   : > { %590 = vmatpush.bf16.msrb.mxu1 %v1404_v25  ;;  %565 = vmatpush.bf16.msra.mxu2 %v1380_v38  ;;  %v1744_v11 = vld [vmem:[%s3036_s3 + $0x170] sm:$0xf]  ;;  %v1609_v12 = vor.u32 %v1942_v9, %v1608_v8  ;;  %v1976_v14 = vld [vmem:[%s3036_s3 + $0x174] sm:$0xf0]  ;;  %v1451_v18 = vld [vmem:[%s3034_s1 + $0x88] sm:$0xf]  ;;  %v1665_v19 = vor.u32 %v1956_v7, %v1664_v5 }
  0x34   : > { %v1600_v15 = vld [vmem:[%s3036_s3 + $0x50] sm:$0xf]  ;;  %v1940_v16 = vld [vmem:[%s3036_s3 + $0x54] sm:$0xf0]  ;;  %v1903_v20 = vld [vmem:[%s3034_s1 + $0x98] sm:$0xf0]  ;;  %v1745_v23 = vor.u32 %v1976_v14, %v1744_v11 }
  0x35   : > { %540 = vmatmul.bf16.vlgmr.msra.gmra.mxu0 %v2418_v43  ;;  %615 = vmatpush.bf16.msra.mxu3 %v1428_v47  ;;  %v1656_v21 = vld [vmem:[%s3036_s3 + $0xc0] sm:$0xf]  ;;  %v1954_v22 = vld [vmem:[%s3036_s3 + $0xc4] sm:$0xf0]  ;;  %v1601_v24 = vor.u32 %v1940_v16, %v1600_v15  ;;  %v1452_v27 = vor.u32 %v1903_v20, %v1451_v18  ;;  %v1898_v30 = vld [vmem:[%s3034_s1 + $0x70] sm:$0xf0] }
  0x36   : > { %630 = vmatpush.bf16.msrb.mxu0 %v1548_v42  ;;  %566 = vmatmul.bf16.vlgmr.msra.gmra.mxu2 %v2418_v43  ;;  %v1736_v25 = vld [vmem:[%s3036_s3 + $0x160] sm:$0xf]  ;;  %v1974_v26 = vld [vmem:[%s3036_s3 + $0x164] sm:$0xf0]  ;;  %v1657_v29 = vor.u32 %v1954_v22, %v1656_v21  ;;  %v1648_v31 = vld [vmem:[%s3036_s3 + $0xb0] sm:$0xf] }
  0x37   : > { %591 = vmatpush.bf16.msrb.mxu1 %v1384_v40  ;;  %636 = vmatpush.bf16.msrb.mxu2 %v1532_v41  ;;  %v1431_v28 = vld [vmem:[%s3034_s1 + $0x60] sm:$0xf]  ;;  %v1952_v32 = vld [vmem:[%s3036_s3 + $0xb4] sm:$0xf0]  ;;  %v1737_v33 = vor.u32 %v1974_v26, %v1736_v25  ;;  %v1728_v34 = vld [vmem:[%s3036_s3 + $0x150] sm:$0xf] }
  0x38   : > { %v1972_v35 = vld [vmem:[%s3036_s3 + $0x154] sm:$0xf0]  ;;  %v1432_v36 = vor.u32 %v1898_v30, %v1431_v28  ;;  %v1649_v38 = vor.u32 %v1952_v32, %v1648_v31  ;;  %v1893_v39 = vld [vmem:[%s3034_s1 + $0x48] sm:$0xf0]  ;;  %v1640_v40 = vld [vmem:[%s3036_s3 + $0xa0] sm:$0xf] }
  0x39   : > { %616 = vmatpush.bf16.msra.mxu3 %v1408_v58  ;;  %v1411_v37 = vld [vmem:[%s3034_s1 + $0x38] sm:$0xf]  ;;  %v1950_v41 = vld [vmem:[%s3036_s3 + $0xa4] sm:$0xf0]  ;;  %v1729_v42 = vor.u32 %v1972_v35, %v1728_v34  ;;  %v1720_v44 = vld [vmem:[%s3036_s3 + $0x140] sm:$0xf] }
  0x3a   : > { %592 = vmatmul.bf16.vlgmr.msrb.gmra.mxu1 %v2418_v43  ;;  %1158 = vmatpush.bf16.msra.mxu0 %v1617_v6  ;;  %v1970_v45 = vld [vmem:[%s3036_s3 + $0x144] sm:$0xf0]  ;;  %v1412_v47 = vor.u32 %v1893_v39, %v1411_v37  ;;  %v1641_v48 = vor.u32 %v1950_v41, %v1640_v40  ;;  %v1391_v49 = vld [vmem:[%s3034_s1 + $0x10] sm:$0xf]  ;;  %v1888_v50 = vld [vmem:[%s3034_s1 + $0x20] sm:$0xf0] }
  0x3b   : > { %637 = vmatpush.bf16.msrb.mxu2 %v1512_v52  ;;  %1171 = vmatpush.bf16.msra.mxu1 %v1681_v54  ;;  %v1721_v51 = vor.u32 %v1970_v45, %v1720_v44  ;;  %v1808_v52 = vld [vmem:[%s3036_s3 + $0x1f0] sm:$0xf]  ;;  %v1992_v53 = vld [vmem:[%s3036_s3 + $0x1f4] sm:$0xf0]  ;;  %v1392_v54 = vor.u32 %v1888_v50, %v1391_v49  ;;  %v1938_v60 = vld [vmem:[%s3036_s3 + $0x44] sm:$0xf0] }
  0x3c   : > { %v1809_v55 = vor.u32 %v1992_v53, %v1808_v52  ;;  %v1632_v56 = vld [vmem:[%s3036_s3 + $0x90] sm:$0xf]  ;;  %v1948_v57 = vld [vmem:[%s3036_s3 + $0x94] sm:$0xf0]  ;;  %v1800_v63 = vld [vmem:[%s3036_s3 + $0x1e0] sm:$0xf] }
  0x3d   : > { %617 = vmatpush.bf16.msra.mxu3 %v1388_v10  ;;  %v1712_v58 = vld [vmem:[%s3036_s3 + $0x130] sm:$0xf]  ;;  %v1633_v59 = vor.u32 %v1948_v57, %v1632_v56  ;;  %v1990_v0 = vld [vmem:[%s3036_s3 + $0x1e4] sm:$0xf0]  ;;  %v1936_v9 = vld [vmem:[%s3036_s3 + $0x34] sm:$0xf0] }
  0x3e   : > { %1159 = vmatpush.bf16.msra.mxu0 %v1609_v12  ;;  %v1801_v2 = vor.u32 %v1990_v0, %v1800_v63  ;;  %v1946_v3 = vld [vmem:[%s3036_s3 + $0x84] sm:$0xf0]  ;;  %v1584_v8 = vld [vmem:[%s3036_s3 + $0x30] sm:$0xf]  ;;  %v1988_v12 = vld [vmem:[%s3036_s3 + $0x1d4] sm:$0xf0] }
  0x3f   : > { %638 = vmatpush.bf16.msrb.mxu2 %v1492_v1  ;;  %1172 = vmatpush.bf16.msra.mxu1 %v1673_v4  ;;  %v1624_v1 = vld [vmem:[%s3036_s3 + $0x80] sm:$0xf]  ;;  %v1966_v5 = vld [vmem:[%s3036_s3 + $0x124] sm:$0xf0]  ;;  %v1792_v10 = vld [vmem:[%s3036_s3 + $0x1d0] sm:$0xf]  ;;  %v1585_v11 = vor.u32 %v1936_v9, %v1584_v8 }
  0x40   : > { %618 = vmatmul.bf16.vlgmr.msra.gmra.mxu3 %v2418_v43  ;;  %v1704_v4 = vld [vmem:[%s3036_s3 + $0x120] sm:$0xf]  ;;  %v1625_v6 = vor.u32 %v1946_v3, %v1624_v1  ;;  %v1618_v14 = vld [vmem:[%s3036_s3 + $0x78] sm:$0xf0]  ;;  %v1793_v15 = vor.u32 %v1988_v12, %v1792_v10  ;;  %v1964_v18 = vld [vmem:[%s3036_s3 + $0x114] sm:$0xf0] }
  0x41   : > { %656 = vmatpush.bf16.msrb.mxu3 %v1552_v13  ;;  %v1705_v7 = vor.u32 %v1966_v5, %v1704_v4  ;;  %v1943_v13 = vld [vmem:[%s3036_s3 + $0x74] sm:$0xf]  ;;  %v1576_v20 = vld [vmem:[%s3036_s3 + $0x20] sm:$0xf]  ;;  %v1934_v21 = vld [vmem:[%s3036_s3 + $0x24] sm:$0xf0] }
  0x42   : > { %1160 = vmatpush.bf16.msra.mxu0 %v1601_v24  ;;  %v1621_v16 = vor.u32 %v1943_v13, %v1618_v14  ;;  %v1784_v22 = vld [vmem:[%s3036_s3 + $0x1c0] sm:$0xf]  ;;  %v1986_v24 = vld [vmem:[%s3036_s3 + $0x1c4] sm:$0xf0]  ;;  %v1941_v25 = vld [vmem:[%s3036_s3 + $0x64] sm:$0xf] }
  0x43   : > { %639 = vmatpush.bf16.msrb.mxu2 %v1472_v17  ;;  %1173 = vmatpush.bf16.msra.mxu1 %v1665_v19  ;;  %v1696_v17 = vld [vmem:[%s3036_s3 + $0x110] sm:$0xf]  ;;  %v1610_v26 = vld [vmem:[%s3036_s3 + $0x68] sm:$0xf0]  ;;  %v1962_v30 = vld [vmem:[%s3036_s3 + $0x104] sm:$0xf0] }
  0x44   : > { %v1697_v19 = vor.u32 %v1964_v18, %v1696_v17  ;;  %v1613_v28 = vor.u32 %v1941_v25, %v1610_v26  ;;  %v1568_v31 = vld [vmem:[%s3036_s3 + $0x10] sm:$0xf]  ;;  %v1984_v35 = vld [vmem:[%s3036_s3 + $0x1b4] sm:$0xf0]  ;;  %v1602_v39 = vld [vmem:[%s3036_s3 + $0x58] sm:$0xf0] }
  0x45   : > { %1184 = vmatpush.bf16.msra.mxu3 %v1745_v23  ;;  %1556 = vmatmul.msk.bf16.vlgmr.msrb.gmra.mxu0 %vm528_vm0, %v2292_v46  ;;  %v1577_v23 = vor.u32 %v1934_v21, %v1576_v20  ;;  %v1776_v34 = vld [vmem:[%s3036_s3 + $0x1b0] sm:$0xf]  ;;  %v1959_v40 = vld [vmem:[%s3036_s3 + $0xf4] sm:$0xf]  ;;  %v1560_v45 = vld [vmem:[%s3036_s3] sm:$0xf] }
  0x46   : > { %v1777_v37 = vor.u32 %v1984_v35, %v1776_v34  ;;  %v1982_v50 = vld [vmem:[%s3036_s3 + $0x1a4] sm:$0xf0]  ;;  %v1594_v52 = vld [vmem:[%s3036_s3 + $0x48] sm:$0xf0]  ;;  %v1586_v63 = vld [vmem:[%s3036_s3 + $0x38] sm:$0xf0] }
  0x47   : > { %640 = vmatpush.bf16.msrb.mxu2 %v1452_v27  ;;  %1174 = vmatpush.bf16.msra.mxu1 %v1657_v29  ;;  %v1785_v27 = vor.u32 %v1986_v24, %v1784_v22  ;;  %v1688_v29 = vld [vmem:[%s3036_s3 + $0x100] sm:$0xf]  ;;  %v1674_v56 = vld [vmem:[%s3036_s3 + $0xe8] sm:$0xf0]  ;;  %v1955_v0 = vld [vmem:[%s3036_s3 + $0xd4] sm:$0xf] }
  0x48   : > { %v1689_v32 = vor.u32 %v1962_v30, %v1688_v29  ;;  %v1864_v3 = vld [vmem:[%s3036_s3 + $0x260] sm:$0xf]  ;;  %v2006_v4 = vld [vmem:[%s3036_s3 + $0x264] sm:$0xf0]  ;;  %v1933_v9 = vld [vmem:[%s3036_s3 + $0x24] sm:$0xf] }
  0x49   : > { %1185 = vmatpush.bf16.msra.mxu3 %v1737_v33  ;;  %v1932_v33 = vld [vmem:[%s3036_s3 + $0x14] sm:$0xf0]  ;;  %v1978_v8 = vld [vmem:[%s3036_s3 + $0x184] sm:$0xf0]  ;;  %v1953_v12 = vld [vmem:[%s3036_s3 + $0xc4] sm:$0xf] }
  0x4a   : > { %v1658_v14 = vld [vmem:[%s3036_s3 + $0xc8] sm:$0xf0]  ;;  %v1975_v20 = vld [vmem:[%s3036_s3 + $0x174] sm:$0xf]  ;;  %v1746_v21 = vld [vmem:[%s3036_s3 + $0x178] sm:$0xf0] }
  0x4b   : > { %641 = vmatpush.bf16.msrb.mxu2 %v1432_v36  ;;  %1175 = vmatpush.bf16.msra.mxu1 %v1649_v38  ;;  %v1569_v36 = vor.u32 %v1932_v33, %v1568_v31  ;;  %v1939_v38 = vld [vmem:[%s3036_s3 + $0x54] sm:$0xf]  ;;  %v1661_v18 = vor.u32 %v1953_v12, %v1658_v14  ;;  %v1749_v22 = vor.u32 %v1975_v20, %v1746_v21  ;;  %v1570_v24 = vld [vmem:[%s3036_s3 + $0x18] sm:$0xf0]  ;;  %v2002_v29 = vld [vmem:[%s3036_s3 + $0x244] sm:$0xf0] }
  0x4c   : > { %v1605_v41 = vor.u32 %v1939_v38, %v1602_v39  ;;  %v1951_v25 = vld [vmem:[%s3036_s3 + $0xb4] sm:$0xf]  ;;  %v1738_v33 = vld [vmem:[%s3036_s3 + $0x168] sm:$0xf0]  ;;  %v1929_v35 = vld [vmem:[%s3036_s3 + $0x4] sm:$0xf] }
  0x4d   : > { %1186 = vmatpush.bf16.msra.mxu3 %v1729_v42  ;;  %v1682_v42 = vld [vmem:[%s3036_s3 + $0xf8] sm:$0xf0]  ;;  %s1304_s15 = sshll.u32 %s217_s9, 4  ;;  %s1305_s15 = int_to_ptr.vmem [resolvable:$true] %s1304_s15 }
  0x4e   : > { %v1685_v44 = vor.u32 %v1959_v40, %v1682_v42  ;;  %v1642_v40 = vld [vmem:[%s3036_s3 + $0xa8] sm:$0xf0]  ;;  %v2000_v42 = vld [vmem:[%s3036_s3 + $0x234] sm:$0xf0] }
  0x4f   : > { %642 = vmatpush.bf16.msrb.mxu2 %v1412_v47  ;;  %1176 = vmatpush.bf16.msra.mxu1 %v1641_v48  ;;  %v1930_v47 = vld [vmem:[%s3036_s3 + $0x4] sm:$0xf0]  ;;  %v1768_v48 = vld [vmem:[%s3036_s3 + $0x1a0] sm:$0xf] }
  0x50   : > { %1557 = vmatmul.msk.bf16.vlgmr.msrb.gmra.mxu3 %vm528_vm0, %v2292_v46  ;;  %v1968_v46 = vld [vmem:[%s3036_s3 + $0x134] sm:$0xf0]  ;;  %v1561_v49 = vor.u32 %v1930_v47, %v1560_v45  ;;  %v1769_v53 = vor.u32 %v1982_v50, %v1768_v48  ;;  %v1971_v47 = vld [vmem:[%s3036_s3 + $0x154] sm:$0xf]  ;;  %v1730_v48 = vld [vmem:[%s3036_s3 + $0x158] sm:$0xf0] }
  0x51   : > { %1187 = vmatpush.bf16.msra.mxu3 %v1721_v51  ;;  %v1713_v61 = vor.u32 %v1968_v46, %v1712_v58  ;;  %v1937_v51 = vld [vmem:[%s3036_s3 + $0x44] sm:$0xf]  ;;  %v1872_v58 = vld [vmem:[%s3036_s3 + $0x270] sm:$0xf]  ;;  %v1733_v50 = vor.u32 %v1971_v47, %v1730_v48  ;;  %v1987_v48 = vld [vmem:[%s3036_s3 + $0x1d4] sm:$0xf] }
  0x53   : > { %643 = vmatpush.bf16.msrb.mxu2 %v1392_v54  ;;  %1177 = vmatpush.bf16.msra.mxu1 %v1633_v59  ;;  %v1597_v54 = vor.u32 %v1937_v51, %v1594_v52  ;;  %v2008_v59 = vld [vmem:[%s3036_s3 + $0x274] sm:$0xf0]  ;;  %v1947_v51 = vld [vmem:[%s3036_s3 + $0x94] sm:$0xf]  ;;  %v1634_v52 = vld [vmem:[%s3036_s3 + $0x98] sm:$0xf0] }
  0x54   : > { %v1873_v46 = vor.u32 %v2008_v59, %v1872_v58  ;;  %v1722_v58 = vld [vmem:[%s3036_s3 + $0x148] sm:$0xf0] }
  0x55   : > { %1188 = vmatpush.bf16.msra.mxu3 %v1713_v61 }
  0x56   : > { %644 = vmatmul.bf16.vlgmr.msrb.gmra.mxu2 %v2418_v43  ;;  %v1592_v43 = vld [vmem:[%s3036_s3 + $0x40] sm:$0xf] }
  0x57   : > { %1197 = vmatpush.bf16.msra.mxu2 %v1809_v55  ;;  %v1593_v62 = vor.u32 %v1938_v60, %v1592_v43  ;;  %1178 = vmatpush.bf16.msra.mxu1 %v1625_v6  ;;  %v1957_v55 = vld [vmem:[%s3036_s3 + $0xe4] sm:$0xf]  ;;  %v1760_v43 = vld [vmem:[%s3036_s3 + $0x190] sm:$0xf]  ;;  %v1980_v60 = vld [vmem:[%s3036_s3 + $0x194] sm:$0xf0]  ;;  %v1865_v6 = vor.u32 %v2006_v4, %v1864_v3 }
  0x58   : > { %v1677_v57 = vor.u32 %v1957_v55, %v1674_v56  ;;  %v1761_v61 = vor.u32 %v1980_v60, %v1760_v43  ;;  %v1998_v55 = vld [vmem:[%s3036_s3 + $0x224] sm:$0xf0]  ;;  %v1969_v56 = vld [vmem:[%s3036_s3 + $0x144] sm:$0xf]  ;;  %v1626_v60 = vld [vmem:[%s3036_s3 + $0x88] sm:$0xf0] }
  0x59   : > { %1161 = vmatpush.bf16.msra.mxu0 %v1593_v62  ;;  %1189 = vmatpush.bf16.msra.mxu3 %v1705_v7  ;;  %v1935_v62 = vld [vmem:[%s3036_s3 + $0x34] sm:$0xf]  ;;  %v1752_v7 = vld [vmem:[%s3036_s3 + $0x180] sm:$0xf]  ;;  %v1725_v59 = vor.u32 %v1969_v56, %v1722_v58  ;;  %v1945_v43 = vld [vmem:[%s3036_s3 + $0x84] sm:$0xf] }
  0x5a   : > { %v1589_v1 = vor.u32 %v1935_v62, %v1586_v63  ;;  %v1753_v10 = vor.u32 %v1978_v8, %v1752_v7  ;;  %v1629_v62 = vor.u32 %v1945_v43, %v1626_v60  ;;  %v1824_v63 = vld [vmem:[%s3036_s3 + $0x210] sm:$0xf]  ;;  %v1714_v3 = vld [vmem:[%s3036_s3 + $0x138] sm:$0xf0]  ;;  %v1965_v7 = vld [vmem:[%s3036_s3 + $0x124] sm:$0xf] }
  0x5b   : > { %1198 = vmatpush.bf16.msra.mxu2 %v1801_v2  ;;  %1223 = vmatpush.bf16.msrb.mxu1 %v1621_v16  ;;  %v1666_v2 = vld [vmem:[%s3036_s3 + $0xd8] sm:$0xf0]  ;;  %v2004_v16 = vld [vmem:[%s3036_s3 + $0x254] sm:$0xf0]  ;;  %v1786_v58 = vld [vmem:[%s3036_s3 + $0x1c8] sm:$0xf0] }
  0x5c   : > { %v1669_v5 = vor.u32 %v1955_v0, %v1666_v2  ;;  %v1996_v0 = vld [vmem:[%s3036_s3 + $0x214] sm:$0xf0] }
  0x5d   : > { %1162 = vmatpush.bf16.msra.mxu0 %v1585_v11  ;;  %1190 = vmatpush.bf16.msra.mxu3 %v1697_v19  ;;  %v1578_v11 = vld [vmem:[%s3036_s3 + $0x28] sm:$0xf0]  ;;  %v1825_v2 = vor.u32 %v1996_v0, %v1824_v63 }
  0x5e   : > { %v1581_v13 = vor.u32 %v1933_v9, %v1578_v11  ;;  %v1706_v9 = vld [vmem:[%s3036_s3 + $0x128] sm:$0xf0] }
  0x5f   : > { %1199 = vmatpush.bf16.msra.mxu2 %v1793_v15  ;;  %1224 = vmatpush.bf16.msrb.mxu1 %v1613_v28  ;;  %v1856_v15 = vld [vmem:[%s3036_s3 + $0x250] sm:$0xf]  ;;  %v1848_v28 = vld [vmem:[%s3036_s3 + $0x240] sm:$0xf]  ;;  %v1709_v12 = vor.u32 %v1965_v7, %v1706_v9  ;;  %v1981_v9 = vld [vmem:[%s3036_s3 + $0x1a4] sm:$0xf] }
  0x60   : > { %v1857_v19 = vor.u32 %v2004_v16, %v1856_v15  ;;  %v1849_v31 = vor.u32 %v2002_v29, %v1848_v28  ;;  %v1690_v29 = vld [vmem:[%s3036_s3 + $0x108] sm:$0xf0] }
  0x61   : > { %1163 = vmatpush.bf16.msra.mxu0 %v1577_v23  ;;  %1191 = vmatpush.bf16.msra.mxu3 %v1689_v32  ;;  %v1931_v23 = vld [vmem:[%s3036_s3 + $0x14] sm:$0xf]  ;;  %v1973_v32 = vld [vmem:[%s3036_s3 + $0x164] sm:$0xf] }
  0x62   : > { %v1573_v26 = vor.u32 %v1931_v23, %v1570_v24  ;;  %v1741_v34 = vor.u32 %v1973_v32, %v1738_v33  ;;  %v1810_v23 = vld [vmem:[%s3036_s3 + $0x1f8] sm:$0xf0]  ;;  %v1989_v33 = vld [vmem:[%s3036_s3 + $0x1e4] sm:$0xf] }
  0x63   : > { %1200 = vmatpush.bf16.msra.mxu2 %v1785_v27  ;;  %1225 = vmatpush.bf16.msrb.mxu1 %v1605_v41  ;;  %v1650_v27 = vld [vmem:[%s3036_s3 + $0xb8] sm:$0xf0]  ;;  %v1840_v41 = vld [vmem:[%s3036_s3 + $0x230] sm:$0xf] }
  0x64   : > { %v1653_v30 = vor.u32 %v1951_v25, %v1650_v27  ;;  %v1841_v45 = vor.u32 %v2000_v42, %v1840_v41  ;;  %v2007_v42 = vld [vmem:[%s3036_s3 + $0x274] sm:$0xf] }
  0x65   : > { %1164 = vmatpush.bf16.msra.mxu0 %v1569_v36  ;;  %1236 = vmatpush.bf16.msrb.mxu3 %v1685_v44  ;;  %v1562_v36 = vld [vmem:[%s3036_s3 + $0x8] sm:$0xf0] }
  0x66   : > { %v1565_v39 = vor.u32 %v1929_v35, %v1562_v36 }
  0x67   : > { %1201 = vmatpush.bf16.msra.mxu2 %v1777_v37  ;;  %1226 = vmatpush.bf16.msrb.mxu1 %v1597_v54  ;;  %v1949_v37 = vld [vmem:[%s3036_s3 + $0xa4] sm:$0xf]  ;;  %v1832_v54 = vld [vmem:[%s3036_s3 + $0x220] sm:$0xf] }
  0x68   : > { %v1645_v44 = vor.u32 %v1949_v37, %v1642_v40 }
  0x69   : > { %1165 = vmatpush.bf16.msra.mxu0 %v1561_v49  ;;  %1237 = vmatpush.bf16.msrb.mxu3 %v1677_v57  ;;  %v1833_v57 = vor.u32 %v1998_v55, %v1832_v54 }
  0x6b   : > { %1202 = vmatpush.bf16.msra.mxu2 %v1769_v53  ;;  %1227 = vmatpush.bf16.msrb.mxu1 %v1589_v1  ;;  %v1637_v53 = vor.u32 %v1947_v51, %v1634_v52  ;;  %v1967_v1 = vld [vmem:[%s3036_s3 + $0x134] sm:$0xf]  ;;  %v2005_v52 = vld [vmem:[%s3036_s3 + $0x264] sm:$0xf] }
  0x6c   : > { %v1717_v4 = vor.u32 %v1967_v1, %v1714_v3  ;;  %v1983_v1 = vld [vmem:[%s3036_s3 + $0x1b4] sm:$0xf] }
  0x6d   : > { %1210 = vmatpush.bf16.msrb.mxu0 %v1873_v46  ;;  %1238 = vmatpush.bf16.msrb.mxu3 %v1669_v5  ;;  %v2838_v46 = vld [vmem:[%s3035_s2] sm:$0x1f] }
  0x6e   : > { %v1816_v5 = vld [vmem:[%s3036_s3 + $0x200] sm:$0xf]  ;;  %v284_v8 = vperm.slane %v2838_v46, 0  ;;  %v285_v25 = vperm.slane %v2838_v46, 1  ;;  %v287_v55 = vperm.slane %v2838_v46, 3 }
  0x6f   : > { %1203 = vmatpush.bf16.msra.mxu2 %v1761_v61  ;;  %1228 = vmatpush.bf16.msrb.mxu1 %v1581_v13 }
  0x71   : > { %1211 = vmatpush.bf16.msrb.mxu0 %v1865_v6  ;;  %1239 = vmatpush.bf16.msrb.mxu3 %v1661_v18  ;;  %v1994_v6 = vld [vmem:[%s3036_s3 + $0x204] sm:$0xf0]  ;;  %v1963_v18 = vld [vmem:[%s3036_s3 + $0x114] sm:$0xf] }
  0x72   : > { %v1817_v11 = vor.u32 %v1994_v6, %v1816_v5  ;;  %v2001_v5 = vld [vmem:[%s3036_s3 + $0x244] sm:$0xf]  ;;  %v1850_v6 = vld [vmem:[%s3036_s3 + $0x248] sm:$0xf0] }
  0x73   : > { %1204 = vmatpush.bf16.msra.mxu2 %v1753_v10  ;;  %1229 = vmatpush.bf16.msrb.mxu1 %v1573_v26  ;;  %v286_v10 = vperm.slane %v2838_v46, 2 }
  0x75   : > { %1212 = vmatpush.bf16.msrb.mxu0 %v1857_v19  ;;  %1240 = vmatpush.bf16.msrb.mxu3 %v1653_v30  ;;  %v1698_v19 = vld [vmem:[%s3036_s3 + $0x118] sm:$0xf0] }
  0x76   : > { %v1701_v24 = vor.u32 %v1963_v18, %v1698_v19  ;;  %v1979_v19 = vld [vmem:[%s3036_s3 + $0x194] sm:$0xf] }
  0x77   : > { %1249 = vmatpush.bf16.msrb.mxu2 %v1749_v22  ;;  %1230 = vmatpush.bf16.msrb.mxu1 %v1565_v39  ;;  %v1991_v22 = vld [vmem:[%s3036_s3 + $0x1f4] sm:$0xf] }
  0x78   : > { %v1813_v28 = vor.u32 %v1991_v22, %v1810_v23  ;;  %v1997_v22 = vld [vmem:[%s3036_s3 + $0x224] sm:$0xf]  ;;  %v1834_v23 = vld [vmem:[%s3036_s3 + $0x228] sm:$0xf0] }
  0x79   : > { %1213 = vmatpush.bf16.msrb.mxu0 %v1849_v31  ;;  %1241 = vmatpush.bf16.msrb.mxu3 %v1645_v44  ;;  %v1874_v44 = vld [vmem:[%s3036_s3 + $0x278] sm:$0xf0] }
  0x7b   : > { %1250 = vmatpush.bf16.msrb.mxu2 %v1741_v34  ;;  %v1802_v34 = vld [vmem:[%s3036_s3 + $0x1e8] sm:$0xf0] }
  0x7c   : > { %v1805_v47 = vor.u32 %v1989_v33, %v1802_v34 }
  0x7d   : > { %1214 = vmatpush.bf16.msrb.mxu0 %v1841_v45  ;;  %1242 = vmatpush.bf16.msrb.mxu3 %v1637_v53  ;;  %v1866_v53 = vld [vmem:[%s3036_s3 + $0x268] sm:$0xf0] }
  0x7e   : > { %v1869_v43 = vor.u32 %v2005_v52, %v1866_v53 }
  0x7f   : > { %1251 = vmatpush.bf16.msrb.mxu2 %v1733_v50  ;;  %v1877_v50 = vor.u32 %v2007_v42, %v1874_v44 }
  0x81   : > { %1215 = vmatpush.bf16.msrb.mxu0 %v1833_v57  ;;  %1243 = vmatpush.bf16.msrb.mxu3 %v1629_v62  ;;  %v1985_v57 = vld [vmem:[%s3036_s3 + $0x1c4] sm:$0xf]  ;;  %v1858_v62 = vld [vmem:[%s3036_s3 + $0x258] sm:$0xf0] }
  0x82   : > { %v1789_v63 = vor.u32 %v1985_v57, %v1786_v58 }
  0x83   : > { %1252 = vmatpush.bf16.msrb.mxu2 %v1725_v59 }
  0x85   : > { %1216 = vmatpush.bf16.msrb.mxu0 %v1825_v2  ;;  %v1778_v2 = vld [vmem:[%s3036_s3 + $0x1b8] sm:$0xf0] }
  0x86   : > { %v1781_v7 = vor.u32 %v1983_v1, %v1778_v2 }
  0x87   : > { %1253 = vmatpush.bf16.msrb.mxu2 %v1717_v4 }
  0x89   : > { %1217 = vmatpush.bf16.msrb.mxu0 %v1817_v11 }
  0x8b   : > { %1254 = vmatpush.bf16.msrb.mxu2 %v1709_v12 }
  0x8f   : > { %1255 = vmatpush.bf16.msrb.mxu2 %v1701_v24 }
  0x9d   : > { %v2759_v17 = vpop.f32.mrf.mxu1 }
  0xa3   : > { %v2800_v38 = vpop.f32.mrf.mxu3 }
  0xa5   : > { %v556_v49 = vpop.f32.mrf.mxu1 }
  0xab   : > { %v582_v61 = vpop.f32.mrf.mxu3 }
  0xac   : > { %v2003_v61 = vld [vmem:[%s3036_s3 + $0x254] sm:$0xf] }
  0xad   : > { %v1861_v4 = vor.u32 %v2003_v61, %v1858_v62 }
  0xb2   : > { %v541_v13 = vpop.f32.mrf.mxu0 }
  0xb3   : > { %v542_v14 = vadd.f32 %v541_v13, %v284_v8  ;;  %v606_v15 = vpop.f32.mrf.mxu3  ;;  %v1853_v13 = vor.u32 %v2001_v5, %v1850_v6 }
  0xb5   : > { %v555_v20 = vadd.f32 %v2759_v17, %v542_v14  ;;  %v1961_v17 = vld [vmem:[%s3036_s3 + $0x104] sm:$0xf] }
  0xb6   : > { %v1693_v35 = vor.u32 %v1961_v17, %v1690_v29  ;;  %v1995_v29 = vld [vmem:[%s3036_s3 + $0x214] sm:$0xf] }
  0xb7   : > { %v593_v16 = vpop.f32.mrf.mxu1  ;;  %v662_v26 = vmax.f32 %v555_v20, 0.0  ;;  %v1762_v20 = vld [vmem:[%s3036_s3 + $0x198] sm:$0xf0] }
  0xb8   : > { %v594_v21 = vadd.f32 %v593_v16, %v286_v10  ;;  %1256 = vmatpush.bf16.msrb.mxu2 %v1693_v35  ;;  %v1770_v10 = vld [vmem:[%s3036_s3 + $0x1a8] sm:$0xf0]  ;;  %v1842_v16 = vld [vmem:[%s3036_s3 + $0x238] sm:$0xf0]  ;;  %v1765_v24 = vor.u32 %v1979_v19, %v1762_v20 }
  0xb9   : > { %v2892_v30 = vpack.c.bf16 %v662_v26, %v662_v26  ;;  %v567_v32 = vpop.f32.mrf.mxu2  ;;  %v1773_v18 = vor.u32 %v1981_v9, %v1770_v10  ;;  %v1754_v26 = vld [vmem:[%s3036_s3 + $0x188] sm:$0xf0] }
  0xba   : > { %v607_v27 = vadd.f32 %v606_v15, %v594_v21  ;;  %v568_v36 = vadd.f32 %v567_v32, %v285_v25  ;;  %v543_v37 = vpop.f32.mrf.mxu0  ;;  %v1999_v15 = vld [vmem:[%s3036_s3 + $0x234] sm:$0xf]  ;;  %v1977_v25 = vld [vmem:[%s3036_s3 + $0x184] sm:$0xf] }
  0xbb   : > { %1166 = vmatmul.bf16.vlgmr.msra.gmra.mxu0 %v2892_v30  ;;  %v608_v40 = vpop.f32.mrf.mxu3  ;;  %v1845_v21 = vor.u32 %v1999_v15, %v1842_v16  ;;  %v1757_v32 = vor.u32 %v1977_v25, %v1754_v26 }
  0xbc   : > { %v664_v31 = vmax.f32 %v607_v27, 0.0  ;;  %v581_v41 = vadd.f32 %v2800_v38, %v568_v36  ;;  %1262 = vmatpush.bf16.msra.mxu0 %v1813_v28  ;;  %v1794_v38 = vld [vmem:[%s3036_s3 + $0x1d8] sm:$0xf0]  ;;  %v288_v27 = vperm.slane %v2838_v46, 4  ;;  %v1837_v28 = vor.u32 %v1997_v22, %v1834_v23  ;;  %v1993_v46 = vld [vmem:[%s3036_s3 + $0x204] sm:$0xf] }
  0xbd   : > { %v1797_v54 = vor.u32 %v1987_v48, %v1794_v38 }
  0xbe   : > { %v2900_v39 = vpack.c.bf16 %v664_v31, %v664_v31  ;;  %v663_v49 = vmax.f32 %v581_v41, 0.0  ;;  %v1826_v31 = vld [vmem:[%s3036_s3 + $0x218] sm:$0xf0] }
  0xbf   : > { %v595_v45 = vpop.f32.mrf.mxu1  ;;  %v1829_v35 = vor.u32 %v1995_v29, %v1826_v31 }
  0xc0   : > { %1192 = vmatmul.bf16.vlgmr.msra.gmra.mxu3 %v2900_v39  ;;  %v668_v51 = vpack.c.bf16 %v663_v49, %v663_v49  ;;  %1263 = vmatpush.bf16.msra.mxu0 %v1805_v47 }
  0xc1   : > { %v569_v56 = vpop.f32.mrf.mxu2 }
  0xc2   : > { %1179 = vmatmul.bf16.vlgmr.msra.gmra.mxu1 %v668_v51  ;;  %v632_v59 = vpop.f32.mrf.mxu0 }
  0xc3   : > { %1275 = vmatpush.bf16.msra.mxu1 %v1877_v50  ;;  %v619_v60 = vpop.f32.mrf.mxu3 }
  0xc4   : > { %1264 = vmatpush.bf16.msra.mxu0 %v1797_v54  ;;  %v620_v0 = vadd.f32 %v619_v60, %v287_v55 }
  0xc6   : > { %v633_v3 = vadd.f32 %v632_v59, %v620_v0 }
  0xc7   : > { %1276 = vmatpush.bf16.msra.mxu1 %v1869_v43 }
  0xc8   : > { %1265 = vmatpush.bf16.msra.mxu0 %v1789_v63  ;;  %v665_v8 = vmax.f32 %v633_v3, 0.0 }
  0xca   : > { %v634_v11 = vpop.f32.mrf.mxu0  ;;  %v670_v12 = vpack.c.bf16 %v665_v8, %v665_v8 }
  0xcb   : > { %1277 = vmatpush.bf16.msra.mxu1 %v1861_v4  ;;  %v621_v14 = vpop.f32.mrf.mxu3 }
  0xcc   : > { %1266 = vmatpush.bf16.msra.mxu0 %v1781_v7  ;;  %1205 = vmatmul.bf16.vlgmr.msra.gmra.mxu2 %v670_v12 }
  0xcf   : > { %1278 = vmatpush.bf16.msra.mxu1 %v1853_v13 }
  0xd0   : > { %1244 = vmatmul.bf16.vlgmr.msrb.gmra.mxu3 %v668_v51  ;;  %1267 = vmatpush.bf16.msra.mxu0 %v1773_v18  ;;  %v752_v51 = vld [vmem:[%s3037_s4] sm:$0x3] }
  0xd1   : > { %v754_v52 = vperm.slane %v752_v51, 0  ;;  %v755_v1 = vperm.slane %v752_v51, 1 }
  0xd2   : > { %1231 = vmatmul.bf16.vlgmr.msrb.gmra.mxu1 %v2892_v30  ;;  %v1818_v30 = vld [vmem:[%s3036_s3 + $0x208] sm:$0xf0] }
  0xd3   : > { %1279 = vmatpush.bf16.msra.mxu1 %v1845_v21  ;;  %v658_v17 = vpop.f32.mrf.mxu3  ;;  %v1821_v40 = vor.u32 %v1993_v46, %v1818_v30 }
  0xd4   : > { %1268 = vmatpush.bf16.msra.mxu0 %v1765_v24 }
  0xd7   : > { %1280 = vmatpush.bf16.msra.mxu1 %v1837_v28 }
  0xd8   : > { %1269 = vmatpush.bf16.msra.mxu0 %v1757_v32 }
  0xd9   : > { %v645_v33 = vpop.f32.mrf.mxu2 }
  0xda   : > { %v646_v34 = vadd.f32 %v645_v33, %v288_v27 }
  0xdb   : > { %1281 = vmatpush.bf16.msra.mxu1 %v1829_v35  ;;  %v660_v41 = vpop.f32.mrf.mxu3 }
  0xdc   : > { %v659_v36 = vadd.f32 %v658_v17, %v646_v34  ;;  %1257 = vmatmul.bf16.vlgmr.msrb.gmra.mxu2 %v2900_v39 }
  0xde   : > { %v666_v37 = vmax.f32 %v659_v36, 0.0 }
  0xdf   : > { %1282 = vmatpush.bf16.msra.mxu1 %v1821_v40 }
  0xe0   : > { %v671_v42 = vpack.c.bf16 %v666_v37, %v666_v37 }
  0xe1   : > { %v647_v44 = vpop.f32.mrf.mxu2 }
  0xe2   : > { %1218 = vmatmul.bf16.vlgmr.msrb.gmra.mxu0 %v671_v42  ;;  %1283 = vmatmul.bf16.vlgmr.msra.gmra.mxu1 %v671_v42 }
  0xf2   : > { %1270 = vmatmul.bf16.vlgmr.msra.gmra.mxu0 %v670_v12 }
 0x138   : > { %v1167_v45 = vpop.f32.mrf.mxu0 }
 0x139   : > { %v1168_v55 = vadd.f32 %v1167_v45, %v754_v52 }
 0x13f   : > { %v1180_v47 = vpop.f32.mrf.mxu1 }
 0x140   : > { %v1169_v38 = vpop.f32.mrf.mxu0  ;;  %v1181_v56 = vadd.f32 %v1180_v47, %v1168_v55 }
 0x143   : > { %v1193_v48 = vpop.f32.mrf.mxu3 }
 0x144   : > { %v1194_v43 = vadd.f32 %v1193_v48, %v1181_v56 }
 0x147   : > { %v1182_v49 = vpop.f32.mrf.mxu1 }
 0x14b   : > { %v1195_v50 = vpop.f32.mrf.mxu3 }
 0x14f   : > { %v1232_v53 = vpop.f32.mrf.mxu1  ;;  %v1206_v39 = vpop.f32.mrf.mxu2 }
 0x150   : > { %v1207_v60 = vadd.f32 %v1206_v39, %v1194_v43  ;;  %v1233_v3 = vadd.f32 %v1232_v53, %v755_v1 }
 0x153   : > { %v1245_v54 = vpop.f32.mrf.mxu3 }
 0x154   : > { %v1246_v6 = vadd.f32 %v1245_v54, %v1233_v3 }
 0x157   : > { %v1234_v57 = vpop.f32.mrf.mxu1  ;;  %v1208_v58 = vpop.f32.mrf.mxu2 }
 0x15b   : > { %v1247_v59 = vpop.f32.mrf.mxu3 }
 0x15f   : > { %v1219_v61 = vpop.f32.mrf.mxu0  ;;  %v1284_v63 = vpop.f32.mrf.mxu1 }
 0x160   : > { %v1220_v62 = vadd.f32 %v1219_v61, %v1207_v60  ;;  %v1258_v0 = vpop.f32.mrf.mxu2 }
 0x161   : > { %v1259_v7 = vadd.f32 %v1258_v0, %v1246_v6 }
 0x162   : > { %1288 = vst [vmem:[%s217_s9] sm:$0xff] %v1220_v62 }
 0x167   : > { %v1221_v2 = vpop.f32.mrf.mxu0  ;;  %v1286_v4 = vpop.f32.mrf.mxu1 }
 0x168   : > { %v1260_v5 = vpop.f32.mrf.mxu2 }
 0x16f   : > { %v1271_v8 = vpop.f32.mrf.mxu0 }
 0x170   : > { %v1272_v9 = vadd.f32 %v1271_v8, %v1259_v7 }
 0x172   : > { %v1285_v10 = vadd.f32 %v1284_v63, %v1272_v9 }
 0x174   : > { %1289 = vst.msk [vmem:[%s217_s9 + $0x8] sm:$0xff] %vm528_vm0, %v1285_v10 }
 0x175   : > { %2076 = shalt.err (!%p2073_p3)
}
 0x176   : > { %2010 = dma.vmem_to_hbm [thread:$0]  (%p2181_p5), %s1305_s15, 256, %s1307_s16, %s1291_s22  }
 0x177   : > { %v1273_v11 = vpop.f32.mrf.mxu0 }
 0x178 PF: > { %p2016_p4 = scmp.ge.s32.totalorder %s2111_s21, 2  ;;  %s1318_s7 = sand.u32 1, %s2099_s18  }
 0x179   : > { %s1319_s8 = scalar_lea.sflag [#allocation3], %s1318_s7 }
 0x17a   : > { %p2013_p7 = pnand %p2016_p4, %p2185_p6 }
 0x17c   : > { %p2014_p8 = pneg %p2013_p7 }
 0x17e   : > { %2094 = dma.done.wait (%p2014_p8), %s1319_s8, 256  }
 0x17f   : > { %2096 = vsyncadd (%p2014_p8), %s1319_s8, 4294967040  ;;  %p15_p9 = scmp.ge.s32.totalorder %s2168_s24, 4   ;;  %s3041_s18 = smov %s2103_s19 }
 0x180   : > { %s3042_s19 = smov %s2107_s20  ;;  %s3043_s20 = smov %s2179_s27 }
 0x181   : > { %s3044_s21 = smov %s2168_s24  ;;  %17 = sbr.rel (!%p15_p9) target bundleno = 3 (0x3), region = 75 }
 0x186   :  { %1325 = vsyncpa [#allocation3], 1 }
 0x187   :  { %1327 = vsyncpa [#allocation3 + $0x1], 1 }

</bundles_post_ra>
